<compile_context>
chip_gen: v6e
topology: v6e:2x2x1
jax: 0.10.0
libtpu: 0.0.40
codegen_flags: <defaults>
</compile_context>

<pallas_src>
import functools

import jax
import jax.numpy as jnp
from jax.experimental import pallas as pl
from jax.experimental.pallas import tpu as pltpu


# ---------------------------------------------------------------------------
# Tiling plan helpers
# ---------------------------------------------------------------------------
def _ceil_to(x, m):
    return ((x + m - 1) // m) * m


def _tpu_flavor():
    """Best-effort chip-generation probe (tuning knobs only, never correctness)."""
    try:
        kind = jax.devices()[0].device_kind.lower()
    except Exception:
        kind = ""
    is_v7 = ("v7" in kind) or ("tpu7" in kind) or ("7x" in kind)
    # v7x: 64 MiB VMEM / TensorCore, 2 TCs per chip.  v5e/v6e: 128 MiB, 1 TC.
    vmem_limit = (48 if is_v7 else 96) * 1024 * 1024
    return is_v7, vmem_limit


def _k_plan(In, *, tk_max=512):
    """K (reduction/In) tile.  Full-K block if it fits, else 128-multiple tiles.
    Zero padding on K is exact (padded x columns hit zero weight rows)."""
    if In <= tk_max:
        return In, In                     # single full-K block, no padding
    for t in (tk_max, 384, 256, 128):
        if In % t == 0:
            return t, In
    return 128, _ceil_to(In, 128)         # pad K up to the tile multiple


def _n_plan(Out, *, tn_max=512):
    """N (output) tile.  Always lane-dense: Out padded to a multiple of 128 so
    output stores are full-width vst instead of masked partial stores."""
    Outp = _ceil_to(Out, 128)
    for t in (tn_max, 384, 256, 128):
        if t <= Outp and Outp % t == 0:
            return t, Outp
    return 128, Outp


def _m_plan(B, *, tm_max=512, two_cores=False, single_n_block=False):
    """Batch (M) tile.  No batch padding: grid uses pl.cdiv and the ragged last
    tile's OOB output rows are masked on writeback."""
    if B > tm_max:
        return tm_max
    tm = B
    # v7x has 2 TensorCores: make sure the 'parallel' axes have >= 2 blocks
    # when the grid would otherwise collapse to (1, 1, K).
    if two_cores and single_n_block and B >= 16:
        tm = _ceil_to((B + 1) // 2, 8)
    return tm


# ---------------------------------------------------------------------------
# One-time parameter prep (cacheable alongside the model params)
# ---------------------------------------------------------------------------
def prepare_params(weight, bias, input_size):
    """weight: [Out, In] (PyTorch layout), bias: [Out].

    Returns (w_t_padded [Inp, Outp], b_padded [1, Outp]): the weight is
    transposed once to the MXU-canonical [K, N] layout and zero-padded so the
    kernel sees lane-dense N tiles and an exact K reduction.
    """
    Out, In = weight.shape
    assert In == input_size
    tk, Inp = _k_plan(In)
    tn, Outp = _n_plan(Out)
    w_t = jnp.transpose(weight)                            # [In, Out], paid once
    w_p = jnp.pad(w_t, ((0, Inp - In), (0, Outp - Out)))
    b_p = jnp.pad(bias, ((0, Outp - Out),)).reshape(1, Outp)
    return w_p, b_p


# ---------------------------------------------------------------------------
# Kernels
# ---------------------------------------------------------------------------
def linear_kernel_f32_out(x_ref, w_ref, b_ref, o_ref):
    """f32 output: accumulate directly into the resident output block
    (it is revisited across the K axis), bias folded into the k==0 init."""
    k = pl.program_id(2)

    @pl.when(k == 0)
    def _init():
        o_ref[...] = jnp.broadcast_to(b_ref[...], o_ref.shape)

    o_ref[...] += jnp.dot(x_ref[...], w_ref[...],
                          preferred_element_type=jnp.float32)


def linear_kernel_acc(x_ref, w_ref, b_ref, o_ref, acc_ref):
    """Low-precision output: f32 VMEM accumulator, single cast on the last K step."""
    k = pl.program_id(2)

    @pl.when(k == 0)
    def _init():
        acc_ref[...] = jnp.broadcast_to(b_ref[...].astype(jnp.float32),
                                        acc_ref.shape)

    acc_ref[...] += jnp.dot(x_ref[...], w_ref[...],
                            preferred_element_type=jnp.float32)

    @pl.when(k == pl.num_programs(2) - 1)
    def _finalize():
        o_ref[...] = acc_ref[...].astype(o_ref.dtype)


# ---------------------------------------------------------------------------
# Forward wrapper
# ---------------------------------------------------------------------------
@functools.partial(jax.jit, static_argnames=("out_features", "slice_output"))
def linear_forward(x, w_padded, b_padded, *, out_features, slice_output=True):
    """x: [B, In], w_padded: [Inp, Outp], b_padded: [1, Outp] -> [B, out_features]."""
    B, In = x.shape
    two_cores, vmem_limit = _tpu_flavor()

    tk, Inp = _k_plan(In)
    tn, Outp = _n_plan(out_features)
    assert w_padded.shape == (Inp, Outp), (w_padded.shape, (Inp, Outp))
    assert b_padded.shape == (1, Outp), (b_padded.shape, (1, Outp))

    num_j = Outp // tn
    tm = _m_plan(B, two_cores=two_cores, single_n_block=(num_j == 1))
    num_i = pl.cdiv(B, tm)
    num_k = Inp // tk

    # Only the K (reduction) axis is ever padded per call (exact); batch stays
    # unpadded — the ragged last M tile is handled by masked output writeback.
    xp = x if Inp == In else jnp.pad(x, ((0, 0), (0, Inp - In)))

    if x.dtype == jnp.float32:
        kernel, scratch = linear_kernel_f32_out, []
    else:
        kernel, scratch = linear_kernel_acc, [pltpu.VMEM((tm, tn), jnp.float32)]

    out_p = pl.pallas_call(
        kernel,
        out_shape=jax.ShapeDtypeStruct((B, Outp), x.dtype),
        grid_spec=pltpu.PrefetchScalarGridSpec(
            num_scalar_prefetch=0,
            grid=(num_i, num_j, num_k),
            in_specs=[
                pl.BlockSpec((tm, tk), lambda i, j, k: (i, k)),   # x tile
                pl.BlockSpec((tk, tn), lambda i, j, k: (k, j)),   # W^T tile [K, N]
                pl.BlockSpec((1, tn), lambda i, j, k: (0, j)),    # bias tile
            ],
            out_specs=pl.BlockSpec((tm, tn), lambda i, j, k: (i, j)),
            scratch_shapes=scratch,
        ),
        compiler_params=pltpu.CompilerParams(
            # batch/output axes parallel (v7x megacore), K is the reduction.
            dimension_semantics=("parallel", "parallel", "arbitrary"),
            vmem_limit_bytes=vmem_limit,
        ),
    )(xp, w_padded, b_padded)

    if slice_output and Outp != out_features:
        # TODO(synk): fuse this slice into the consumer (softmax / CE loss) to
        # save one padded-output HBM round trip when Out is tiny.
        out_p = out_p[:, :out_features]
    return out_p


# ---------------------------------------------------------------------------
# Demo / correctness check
# ---------------------------------------------------------------------------
if __name__ == "__main__":
    # Small shapes consistent with the module: batch=8, input_size=32,
    # hidden_size=64 (unused by the module), output_size=16.
    batch, input_size, hidden_size, output_size = 8, 32, 64, 16

    key = jax.random.PRNGKey(0)
    kx, kw, kb = jax.random.split(key, 3)

    x = jax.random.normal(kx, (batch, input_size), dtype=jnp.float32)
    # nn.Linear-style uniform(-1/sqrt(in), 1/sqrt(in)) init, PyTorch layout.
    bound = 1.0 / jnp.sqrt(jnp.float32(input_size))
    weight = jax.random.uniform(kw, (output_size, input_size),
                                minval=-bound, maxval=bound, dtype=jnp.float32)
    bias = jax.random.uniform(kb, (output_size,),
                              minval=-bound, maxval=bound, dtype=jnp.float32)

    # One-time parameter prep (transpose + pad to lane-dense layout) — cacheable.
    w_p, b_p = prepare_params(weight, bias, input_size)

    out = linear_forward(x, w_p, b_p, out_features=output_size)
    jax.block_until_ready(out)

    # Reference check vs plain JAX.
    ref = x @ weight.T + bias
    assert out.shape == (batch, output_size), out.shape
    assert jnp.allclose(out, ref, atol=1e-5, rtol=1e-5)

    print("KERNEL_OK")
</pallas_src>

<mosaic_0001>
module attributes {stable_mosaic.version = 11 : i64} {
  func.func @linear_kernel_f32_out(%arg0: i32, %arg1: i32, %arg2: i32, %arg3: memref<8x32xf32, #tpu.memory_space<vmem>>, %arg4: memref<32x128xf32, #tpu.memory_space<vmem>>, %arg5: memref<1x128xf32, #tpu.memory_space<vmem>>, %arg6: memref<8x128xf32, #tpu.memory_space<vmem>>) attributes {dimension_semantics = [#tpu.dimension_semantics<parallel>, #tpu.dimension_semantics<parallel>, #tpu.dimension_semantics<arbitrary>], iteration_bounds = array<i64: 1, 1, 1>, scalar_prefetch = 0 : i64, scratch_operands = 0 : i64, tpu.core_type = #tpu.core_type<tc>, window_params = [{transform_indices = @transform_0, window_bounds = array<i64: 8, 32>}, {transform_indices = @transform_1, window_bounds = array<i64: 32, 128>}, {transform_indices = @transform_2, window_bounds = array<i64: 1, 128>}, {transform_indices = @transform_3, window_bounds = array<i64: 8, 128>}]} {
    %c0_i32 = arith.constant 0 : i32
    %0 = arith.cmpi eq, %arg2, %c0_i32 : i32
    %1 = arith.extui %0 : i1 to i32
    %c0_i32_0 = arith.constant 0 : i32
    %2 = arith.cmpi ne, %1, %c0_i32_0 : i32
    scf.if %2 {
      %c0_8 = arith.constant 0 : index
      %c0_9 = arith.constant 0 : index
      %9 = vector.load %arg5[%c0_8, %c0_9] : memref<1x128xf32, #tpu.memory_space<vmem>>, vector<1x128xf32>
      %10 = vector.shape_cast %9 : vector<1x128xf32> to vector<1x128xf32>
      %11 = vector.broadcast %10 : vector<1x128xf32> to vector<8x128xf32>
      %c0_10 = arith.constant 0 : index
      %c0_11 = arith.constant 0 : index
      %12 = vector.load %arg6[%c0_10, %c0_11] : memref<8x128xf32, #tpu.memory_space<vmem>>, vector<8x128xf32>
      tpu.vector_store %arg6[%c0_10, %c0_11], %11 {strides = array<i32>} : memref<8x128xf32, #tpu.memory_space<vmem>>, vector<8x128xf32>,
    } else {
    }
    %c0 = arith.constant 0 : index
    %c0_1 = arith.constant 0 : index
    %3 = vector.load %arg6[%c0, %c0_1] : memref<8x128xf32, #tpu.memory_space<vmem>>, vector<8x128xf32>
    %c0_2 = arith.constant 0 : index
    %c0_3 = arith.constant 0 : index
    %4 = vector.load %arg3[%c0_2, %c0_3] : memref<8x32xf32, #tpu.memory_space<vmem>>, vector<8x32xf32>
    %c0_4 = arith.constant 0 : index
    %c0_5 = arith.constant 0 : index
    %5 = vector.load %arg4[%c0_4, %c0_5] : memref<32x128xf32, #tpu.memory_space<vmem>>, vector<32x128xf32>
    %cst = arith.constant dense<0.000000e+00> : vector<8x128xf32>
    %6 = tpu.matmul %4, %5, %cst {dimension_numbers = #tpu.dot_dimension_numbers<[1], [0], [0], [1], [0, 0, 1, 1], [], []>} : vector<8x32xf32>, vector<32x128xf32>, vector<8x128xf32> -> vector<8x128xf32>
    %7 = arith.addf %3, %6 : vector<8x128xf32>
    %c0_6 = arith.constant 0 : index
    %c0_7 = arith.constant 0 : index
    %8 = vector.load %arg6[%c0_6, %c0_7] : memref<8x128xf32, #tpu.memory_space<vmem>>, vector<8x128xf32>
    tpu.vector_store %arg6[%c0_6, %c0_7], %7 {strides = array<i32>} : memref<8x128xf32, #tpu.memory_space<vmem>>, vector<8x128xf32>,
    return
  }
  func.func @transform_0(%arg0: i32, %arg1: i32, %arg2: i32) -> (i32, i32) {
    %c0_i32 = arith.constant 0 : i32
    return %arg0, %arg2 : i32, i32
  }
  func.func @transform_1(%arg0: i32, %arg1: i32, %arg2: i32) -> (i32, i32) {
    %c0_i32 = arith.constant 0 : i32
    return %arg2, %arg1 : i32, i32
  }
  func.func @transform_2(%arg0: i32, %arg1: i32, %arg2: i32) -> (i32, i32) {
    %c0_i32 = arith.constant 0 : i32
    %c0_i32_0 = arith.constant 0 : i32
    return %c0_i32, %arg1 : i32, i32
  }
  func.func @transform_3(%arg0: i32, %arg1: i32, %arg2: i32) -> (i32, i32) {
    %c0_i32 = arith.constant 0 : i32
    return %arg0, %arg1 : i32, i32
  }
}

</mosaic_0001>

<bundles_post_ra>
// kernel: linear_forward.1
= control target key start
LH: loop header
LB: loop body
LE: loop exit
PB: predicated region body
PF: predicated region fallthrough
CT: control target
= control target key end

     0   :  { %8 = vsyncpa [#allocation3], 0  ;;  %s281_s0 = inlined_call_operand.hbm [shape: f32[8,32], index: 0, kind: input, shape index: {}]   ;;  %s282_s1 = inlined_call_operand.hbm [shape: f32[32,128], index: 1, kind: input, shape index: {}]   ;;  %s283_s2 = inlined_call_operand.vmem [shape: f32[1,128], index: 2, kind: input, shape index: {}]   ;;  %s284_s3 = inlined_call_operand.hbm [shape: f32[8,128], index: 3, kind: output, shape index: {}]  }
   0x1   :  { %9 = vsyncpa [#allocation6], 0 }
   0x2   :  { %10 = vsyncpa [#allocation4], 0  ;;  %s242_s12 = smov [#allocation2]   ;;  %s243_s14 = smov [#allocation5]  }
   0x3   :  { %s17_s13 = sshll.u32 %s242_s12, 4  ;;  %s26_s15 = sshll.u32 %s243_s14, 4  ;;  %s18_s13 = int_to_ptr.vmem [resolvable:$true] %s17_s13  ;;  %s27_s15 = int_to_ptr.vmem [resolvable:$true] %s26_s15 }
   0x4   :  { %s184_s16 = scalar_lea.vmem %s18_s13, 128  ;;  %p189_p1 = scmp.lt.s32.totalorder %s18_s13, %s18_s13 }
   0x5   :  { %p185_p0 = scmp.ne.s32.totalorder %s18_s13, %s184_s16  ;;  %p190_p2 = scmp.lt.s32.totalorder %s184_s16, %s184_s16 }
   0x7   :  { %p191_p3 = por %p190_p2, %p189_p1 }
   0x9   :  { %p192_p4 = pnand %p191_p3, %p185_p0 }
   0xb   :  { %195 = shalt.err (!%p192_p4)
}
   0xc   :  { %20 = dma.hbm_to_vmem [thread:$0]  %s281_s0, 128, %s18_s13, [#allocation3]  }
   0xd   :  { %s204_s19 = scalar_lea.vmem %s27_s15, 512  ;;  %p209_p6 = scmp.lt.s32.totalorder %s27_s15, %s27_s15 }
   0xe   :  { %p205_p5 = scmp.ne.s32.totalorder %s27_s15, %s204_s19  ;;  %p210_p7 = scmp.lt.s32.totalorder %s204_s19, %s204_s19 }
  0x10   :  { %p211_p8 = por %p210_p7, %p209_p6 }
  0x12   :  { %p212_p9 = pnand %p211_p8, %p205_p5 }
  0x14   :  { %215 = shalt.err (!%p212_p9)
}
  0x15   :  { %s244_s20 = smov 128   ;;  %s245_s21 = smov 8  }
  0x16   :  { %32 = dma.hbm_to_vmem [thread:$0]  %s282_s1, 512, %s27_s15, [#allocation6], %s244_s20, %s244_s20, %s245_s21  }
  0x17   :  { %236 = dma.done.wait [#allocation3], 128  }
  0x18   :  { %237 = vsyncadd [#allocation3], 4294967168 }
  0x19   :  { %238 = dma.done.wait [#allocation6], 512  }
  0x1a   :  { %239 = vsyncadd [#allocation6], 4294966784  ;;  %v246_v0 = vmov 0.0   ;;  %vm247_vm0 = vmmov 0   ;;  %v58_v1 = vld [vmem:[#allocation5 + $0x18] sm:$0xff]  ;;  %v57_v2 = vld [vmem:[#allocation5 + $0x10] sm:$0xff] }
  0x1b   :  { %158 = vmatprep.subr.mxu0 %v246_v0  ;;  %166 = vmatprep.mubr.msk.f32.mxu0 %vm247_vm0, %v246_v0  ;;  %v56_v3 = vld [vmem:[#allocation5 + $0x8] sm:$0xff]  ;;  %v55_v4 = vld [vmem:[#allocation5] sm:$0xff]  ;;  %v54_v5 = vld [vmem:[#allocation2] sm:$0xff]  ;;  %vm59_vm1 = vcmask 261120   ;;  %s248_s24 = smov [#allocation7]  }
  0x1c   :  { %159 = vmatpush3.msra.mxu0 %v58_v1  ;;  %v151_v6 = vld [vmem:[%s283_s2] ss:$0 sm:$0xff]  ;;  %s141_s25 = sshll.u32 %s248_s24, 4  ;;  %s142_s25 = int_to_ptr.vmem [resolvable:$true] %s141_s25 }
  0x1d   :  { %160 = vmatprep.subr.mxu0 %v246_v0  ;;  %s216_s26 = scalar_lea.vmem %s142_s25, 128  ;;  %p221_p11 = scmp.lt.s32.totalorder %s142_s25, %s142_s25 }
  0x1e   :  { %161 = vmatpush3.msra.mxu0 %v57_v2  ;;  %p217_p10 = scmp.ne.s32.totalorder %s142_s25, %s216_s26  ;;  %p222_p12 = scmp.lt.s32.totalorder %s216_s26, %s216_s26 }
  0x1f   :  { %162 = vmatprep.subr.mxu0 %v246_v0 }
  0x20   :  { %163 = vmatpush3.msra.mxu0 %v56_v3  ;;  %p223_p13 = por %p222_p12, %p221_p11 }
  0x21   :  { %164 = vmatprep.subr.mxu0 %v246_v0 }
  0x22   :  { %165 = vmatpush3.msra.mxu0 %v55_v4  ;;  %p224_p0 = pnand %p223_p13, %p217_p10 }
  0x23   :  { %167 = vmatmul.mubr.msk.f32.vlgmr.msra.gmra.mxu0 %vm59_vm1, %v54_v5 }
  0xe3   :  { %v129_v7 = vpop.f32.mrf.mxu0 }
  0xe4   :  { %v133_v8 = vadd.f32 %v151_v6, %v129_v7 }
  0xe5   :  { %v168_v9 = vpop.f32.mrf.mxu0 }
  0xe6   :  { %134 = vst [vmem:[#allocation7] sm:$0xff] %v133_v8 }
  0xe7   :  { %227 = shalt.err (!%p224_p0)
}
  0xe8   :  { %144 = dma.vmem_to_hbm [thread:$0]  %s142_s25, 128, %s284_s3, [#allocation4]  }
  0xe9   :  { %240 = dma.done.wait [#allocation4], 128  }
  0xea   :  { %241 = vsyncadd [#allocation4], 4294967168 }
  0xeb   :  { %148 = vsyncpa [#allocation3], 1 }
  0xec   :  { %149 = vsyncpa [#allocation6], 1 }
  0xed   :  { %150 = vsyncpa [#allocation4], 1 }

</bundles_post_ra>
